<compile_context>
chip_gen: v5e
topology: v5e:2x2
jax: 0.10.0
libtpu: 0.0.40
codegen_flags: <defaults>
</compile_context>

<pallas_src>
import functools

import numpy as np
import jax
import jax.numpy as jnp
from jax import lax
from jax.experimental import pallas as pl
from jax.experimental.pallas import tpu as pltpu


# ----------------------------- Pallas kernel ------------------------------ #
def _dlrm_kernel(dense_ref, sparse_ref, labels_ref,
                 w1_ref, b1_ref, w2_ref, b2_ref,
                 w3d_ref, w3i_ref, b3_ref, w4t_ref, b4_ref,
                 logits_ref, loss_ref):
    mmd = w1_ref.dtype          # matmul operand dtype (f32 or bf16)

    # DenseArch: 2-layer MLP with ReLU (MXU in mmd, accumulate/elementwise f32)
    x = dense_ref[...]
    h1 = jnp.maximum(
        jnp.dot(x, w1_ref[...], preferred_element_type=jnp.float32)
        + b1_ref[...], 0.0)
    de = jnp.maximum(
        jnp.dot(h1.astype(mmd), w2_ref[...], preferred_element_type=jnp.float32)
        + b2_ref[...], 0.0)                                     # (TB, D) f32

    # InteractionArch (dense<->sparse and sparse<->sparse dots in one einsum)
    sp = sparse_ref[...]                                        # (TB, F, D)
    de_c = de.astype(mmd)
    combined = jnp.concatenate([de_c[:, None, :], sp], axis=1)  # (TB, F+1, D)
    inter = jnp.einsum('bfd,bgd->bfg', combined, combined,
                       preferred_element_type=jnp.float32)      # (TB, F+1, F+1)
    tb = inter.shape[0]
    inter_flat = inter.reshape(tb, -1).astype(mmd)              # (TB, (F+1)^2)

    # OverArch hidden layer: split matmul-accumulate (triu selection is folded
    # into w3i; rows of w3i for non-upper-triangle positions are zero).
    h3 = jnp.maximum(
        jnp.dot(de_c, w3d_ref[...], preferred_element_type=jnp.float32)
        + jnp.dot(inter_flat, w3i_ref[...], preferred_element_type=jnp.float32)
        + b3_ref[...], 0.0)                                     # (TB, H3) f32

    # Final linear, produced lane-dense as (1, TB):  w4^T (1,H3) x h3^T
    z = lax.dot_general(w4t_ref[...], h3.astype(mmd),
                        dimension_numbers=(((1,), (1,)), ((), ())),
                        preferred_element_type=jnp.float32) + b4_ref[...]
    logits_ref[...] = z

    # BCEWithLogits per-example (stable formulation), f32, lane-dense.
    y = labels_ref[...]                                         # (1, TB)
    loss_ref[...] = jnp.maximum(z, 0.0) - z * y + jnp.log1p(jnp.exp(-jnp.abs(z)))


# ------------------------------ host helpers ------------------------------ #
@functools.lru_cache(maxsize=None)
def _triu_rows(num_sparse_features: int) -> np.ndarray:
    """Row-major strict-upper-triangle flat indices of the (F+1)x(F+1) matrix,
    matching torch.triu_indices(F+1, F+1, offset=1) ordering."""
    n = num_sparse_features + 1
    rows = [i * n + j for i in range(n) for j in range(i + 1, n)]
    return np.asarray(rows, np.int32)


# ------------------------------ JAX wrapper ------------------------------- #
def dlrm_train_forward(dense_features, sparse_indices, labels, params,
                       *, tile_b=128, matmul_dtype=jnp.float32,
                       vmem_limit_bytes=None):
    """Returns (loss, (loss, logits, labels)), matching DLRMTrain.forward.

    tile_b: batch tile. For multi-tile batches it must be a multiple of 128
    (lane-dense output blocks). Size it for the target chip's VMEM
    (v7x: ~512-1024 rows at Criteo scale; v6e/v5e can go larger) and pass
    vmem_limit_bytes to raise the scoped-VMEM default if needed.
    """
    tables = params["emb_tables"]            # (F, num_emb, D)
    B = dense_features.shape[0]
    F, _, D = tables.shape
    dense_in_dim = dense_features.shape[1]
    H3 = params["w3"].shape[1]

    # SparseArch: sum-pooled embedding bags -> (B, F, D)   (plain-JAX glue)
    # TODO(synk): move gather+pool in-kernel (scalar-prefetch indices + manual
    # DMA of table rows) to avoid the HBM round-trip of pooled embeddings.
    sparse_emb = jax.vmap(lambda t, idx: jnp.take(t, idx, axis=0).sum(axis=1),
                          in_axes=(0, 1), out_axes=1)(tables, sparse_indices)

    # Fold the triu selection into the OverArch first-layer weight.
    # w3 rows: [0:D] -> dense part, [D:] -> interaction pairs in row-major
    # triu order of the (F+1)x(F+1) matrix.
    rows = jnp.asarray(_triu_rows(F))
    w3 = params["w3"].astype(jnp.float32)
    w3_de = w3[:D]                                               # (D, H3)
    w3_int = jnp.zeros(((F + 1) * (F + 1), H3), jnp.float32).at[rows].set(w3[D:])
    w4_t = params["w4"].astype(jnp.float32).T                    # (1, H3)

    mmd = matmul_dtype
    weight_args = (
        params["w1"].astype(mmd), params["b1"].astype(jnp.float32),
        params["w2"].astype(mmd), params["b2"].astype(jnp.float32),
        w3_de.astype(mmd), w3_int.astype(mmd), params["b3"].astype(jnp.float32),
        w4_t.astype(mmd), params["b4"].astype(jnp.float32),
    )

    dense_in = dense_features.astype(mmd)
    sparse_in = sparse_emb.astype(mmd)
    labels_f32 = labels.astype(jnp.float32)
    labels_in = labels_f32.reshape(1, B)

    # ---- batch tiling (pad remainder tile; loss/logits sliced back to B) ----
    if B <= tile_b:
        TB = B
        B_pad = B
    else:
        assert tile_b % 128 == 0, "multi-tile batch requires tile_b % 128 == 0"
        TB = tile_b
        B_pad = pl.cdiv(B, TB) * TB
    if B_pad != B:
        pad = B_pad - B
        dense_in = jnp.pad(dense_in, ((0, pad), (0, 0)))
        sparse_in = jnp.pad(sparse_in, ((0, pad), (0, 0), (0, 0)))
        labels_in = jnp.pad(labels_in, ((0, 0), (0, pad)))

    grid = (B_pad // TB,)

    bmap2 = lambda i: (i, 0)
    bmap3 = lambda i: (i, 0, 0)
    lmap = lambda i: (0, i)          # lane-dense (1, TB) blocks
    cmap = lambda i: (0, 0)          # weights: VMEM-resident, fetched once

    in_specs = ([pl.BlockSpec((TB, dense_in_dim), bmap2),
                 pl.BlockSpec((TB, F, D), bmap3),
                 pl.BlockSpec((1, TB), lmap)]
                + [pl.BlockSpec(w.shape, cmap) for w in weight_args])
    out_specs = (pl.BlockSpec((1, TB), lmap),
                 pl.BlockSpec((1, TB), lmap))
    out_shape = (jax.ShapeDtypeStruct((1, B_pad), jnp.float32),
                 jax.ShapeDtypeStruct((1, B_pad), jnp.float32))

    cp_kwargs = dict(dimension_semantics=("parallel",))
    if vmem_limit_bytes is not None:
        cp_kwargs["vmem_limit_bytes"] = vmem_limit_bytes

    logits2d, loss2d = pl.pallas_call(
        _dlrm_kernel,
        grid=grid,
        in_specs=in_specs,
        out_specs=out_specs,
        out_shape=out_shape,
        compiler_params=pltpu.CompilerParams(**cp_kwargs),
    )(dense_in, sparse_in, labels_in, *weight_args)

    logits = logits2d[0, :B]                       # logits.squeeze(-1)
    loss = jnp.mean(loss2d[0, :B])                 # mean over real rows only
    return loss, (loss, logits, labels_f32)


# --------------------------- pure-JAX reference ---------------------------- #
def _reference(dense_features, sparse_indices, labels, params):
    tables = params["emb_tables"]
    F = tables.shape[0]
    sp = jax.vmap(lambda t, idx: jnp.take(t, idx, axis=0).sum(axis=1),
                  in_axes=(0, 1), out_axes=1)(tables, sparse_indices)
    h1 = jax.nn.relu(dense_features @ params["w1"] + params["b1"])
    de = jax.nn.relu(h1 @ params["w2"] + params["b2"])
    combined = jnp.concatenate([de[:, None, :], sp], axis=1)
    inter = jnp.einsum('bfd,bgd->bfg', combined, combined)
    iu, ju = np.triu_indices(F + 1, k=1)
    flat = inter[:, iu, ju]
    cat = jnp.concatenate([de, flat], axis=1)
    h3 = jax.nn.relu(cat @ params["w3"] + params["b3"])
    z = (h3 @ params["w4"] + params["b4"])[:, 0]
    y = labels.astype(jnp.float32)
    per = jnp.maximum(z, 0.0) - z * y + jnp.log1p(jnp.exp(-jnp.abs(z)))
    return jnp.mean(per), z


# --------------------------------- main ------------------------------------ #
if __name__ == "__main__":
    # Small, DLRM-consistent shapes.
    DENSE_IN = 16   # dense input features
    H1 = 32         # dense arch hidden
    D = 8           # embedding dim == dense arch output
    F = 4           # number of sparse features
    NUM_EMB = 64    # rows per embedding table
    BAG = 2         # indices per embedding bag (fixed length, sum pooling)
    OVER_IN = D + F + (F * (F - 1)) // 2   # 8 + 4 + 6 = 18
    H3 = 16         # over arch hidden
    OUT = 1

    key = jax.random.PRNGKey(0)
    ks = jax.random.split(key, 12)

    params = {
        "emb_tables": jax.random.normal(ks[0], (F, NUM_EMB, D), jnp.float32) * 0.1,
        "w1": jax.random.normal(ks[1], (DENSE_IN, H1), jnp.float32) * 0.1,
        "b1": jax.random.normal(ks[2], (1, H1), jnp.float32) * 0.01,
        "w2": jax.random.normal(ks[3], (H1, D), jnp.float32) * 0.1,
        "b2": jax.random.normal(ks[4], (1, D), jnp.float32) * 0.01,
        "w3": jax.random.normal(ks[5], (OVER_IN, H3), jnp.float32) * 0.1,
        "b3": jax.random.normal(ks[6], (1, H3), jnp.float32) * 0.01,
        "w4": jax.random.normal(ks[7], (H3, OUT), jnp.float32) * 0.1,
        "b4": jax.random.normal(ks[8], (1, OUT), jnp.float32) * 0.01,
    }

    def make_batch(batch_size):
        dense = jax.random.uniform(ks[9], (batch_size, DENSE_IN), jnp.float32)
        sparse = jax.random.randint(ks[10], (batch_size, F, BAG), 0, NUM_EMB, jnp.int32)
        lab = jax.random.bernoulli(ks[11], 0.5, (batch_size,)).astype(jnp.float32)
        return dense, sparse, lab

    # --- Test 1: small batch, single tile, f32 matmuls (tight check) ---
    dense8, sparse8, labels8 = make_batch(8)
    loss, (_, logits, labels_out) = dlrm_train_forward(
        dense8, sparse8, labels8, params, tile_b=128, matmul_dtype=jnp.float32)
    jax.block_until_ready((loss, logits, labels_out))
    ref_loss, ref_logits = _reference(dense8, sparse8, labels8, params)
    np.testing.assert_allclose(np.asarray(logits), np.asarray(ref_logits),
                               rtol=1e-5, atol=1e-5)
    np.testing.assert_allclose(np.asarray(loss), np.asarray(ref_loss),
                               rtol=1e-5, atol=1e-5)

    # --- Test 2: tiled batch (remainder tile exercised: 300 -> 3 x 128), f32 ---
    dense300, sparse300, labels300 = make_batch(300)
    loss_t, (_, logits_t, _) = dlrm_train_forward(
        dense300, sparse300, labels300, params, tile_b=128,
        matmul_dtype=jnp.float32)
    jax.block_until_ready((loss_t, logits_t))
    ref_loss_t, ref_logits_t = _reference(dense300, sparse300, labels300, params)
    np.testing.assert_allclose(np.asarray(logits_t), np.asarray(ref_logits_t),
                               rtol=1e-5, atol=1e-5)
    np.testing.assert_allclose(np.asarray(loss_t), np.asarray(ref_loss_t),
                               rtol=1e-5, atol=1e-5)

    # --- Test 3: tiled batch, bf16 MXU operands, f32 accumulate (loose check) ---
    loss_b, (_, logits_b, _) = dlrm_train_forward(
        dense300, sparse300, labels300, params, tile_b=128,
        matmul_dtype=jnp.bfloat16)
    jax.block_until_ready((loss_b, logits_b))
    np.testing.assert_allclose(np.asarray(logits_b), np.asarray(ref_logits_t),
                               rtol=1e-1, atol=5e-2)
    np.testing.assert_allclose(np.asarray(loss_b), np.asarray(ref_loss_t),
                               rtol=5e-2, atol=5e-2)

    print("KERNEL_OK")
</pallas_src>

<mosaic_0001>
module attributes {stable_mosaic.version = 11 : i64} {
  func.func @_dlrm_kernel(%arg0: i32, %arg1: memref<8x16xf32, #tpu.memory_space<vmem>>, %arg2: memref<8x4x8xf32, #tpu.memory_space<vmem>>, %arg3: memref<1x8xf32, #tpu.memory_space<vmem>>, %arg4: memref<16x32xf32, #tpu.memory_space<vmem>>, %arg5: memref<1x32xf32, #tpu.memory_space<vmem>>, %arg6: memref<32x8xf32, #tpu.memory_space<vmem>>, %arg7: memref<1x8xf32, #tpu.memory_space<vmem>>, %arg8: memref<8x16xf32, #tpu.memory_space<vmem>>, %arg9: memref<25x16xf32, #tpu.memory_space<vmem>>, %arg10: memref<1x16xf32, #tpu.memory_space<vmem>>, %arg11: memref<1x16xf32, #tpu.memory_space<vmem>>, %arg12: memref<1x1xf32, #tpu.memory_space<vmem>>, %arg13: memref<1x8xf32, #tpu.memory_space<vmem>>, %arg14: memref<1x8xf32, #tpu.memory_space<vmem>>) attributes {dimension_semantics = [#tpu.dimension_semantics<parallel>], iteration_bounds = array<i64: 1>, scalar_prefetch = 0 : i64, scratch_operands = 0 : i64, tpu.core_type = #tpu.core_type<tc>, window_params = [{transform_indices = @transform_0, window_bounds = array<i64: 8, 16>}, {transform_indices = @transform_1, window_bounds = array<i64: 8, 4, 8>}, {transform_indices = @transform_2, window_bounds = array<i64: 1, 8>}, {pipeline_mode = #tpu.pipeline_mode<synchronous>, transform_indices = @transform_3, window_bounds = array<i64: 16, 32>}, {pipeline_mode = #tpu.pipeline_mode<synchronous>, transform_indices = @transform_4, window_bounds = array<i64: 1, 32>}, {pipeline_mode = #tpu.pipeline_mode<synchronous>, transform_indices = @transform_5, window_bounds = array<i64: 32, 8>}, {pipeline_mode = #tpu.pipeline_mode<synchronous>, transform_indices = @transform_6, window_bounds = array<i64: 1, 8>}, {pipeline_mode = #tpu.pipeline_mode<synchronous>, transform_indices = @transform_7, window_bounds = array<i64: 8, 16>}, {pipeline_mode = #tpu.pipeline_mode<synchronous>, transform_indices = @transform_8, window_bounds = array<i64: 25, 16>}, {pipeline_mode = #tpu.pipeline_mode<synchronous>, transform_indices = @transform_9, window_bounds = array<i64: 1, 16>}, {pipeline_mode = #tpu.pipeline_mode<synchronous>, transform_indices = @transform_10, window_bounds = array<i64: 1, 16>}, {pipeline_mode = #tpu.pipeline_mode<synchronous>, transform_indices = @transform_11, window_bounds = array<i64: 1, 1>}, {transform_indices = @transform_12, window_bounds = array<i64: 1, 8>}, {transform_indices = @transform_13, window_bounds = array<i64: 1, 8>}]} {
    %c0 = arith.constant 0 : index
    %c0_0 = arith.constant 0 : index
    %0 = vector.load %arg1[%c0, %c0_0] : memref<8x16xf32, #tpu.memory_space<vmem>>, vector<8x16xf32>
    %c0_1 = arith.constant 0 : index
    %c0_2 = arith.constant 0 : index
    %1 = vector.load %arg4[%c0_1, %c0_2] : memref<16x32xf32, #tpu.memory_space<vmem>>, vector<16x32xf32>
    %cst = arith.constant dense<0.000000e+00> : vector<8x32xf32>
    %2 = tpu.matmul %0, %1, %cst {dimension_numbers = #tpu.dot_dimension_numbers<[1], [0], [0], [1], [0, 0, 1, 1], [], []>} : vector<8x16xf32>, vector<16x32xf32>, vector<8x32xf32> -> vector<8x32xf32>
    %c0_3 = arith.constant 0 : index
    %c0_4 = arith.constant 0 : index
    %3 = vector.load %arg5[%c0_3, %c0_4] : memref<1x32xf32, #tpu.memory_space<vmem>>, vector<1x32xf32>
    %4 = vector.broadcast %3 : vector<1x32xf32> to vector<8x32xf32>
    %5 = arith.addf %2, %4 : vector<8x32xf32>
    %cst_5 = arith.constant 0.000000e+00 : f32
    %6 = vector.broadcast %cst_5 : f32 to vector<8x32xf32>
    %7 = arith.maximumf %5, %6 : vector<8x32xf32>
    %c0_6 = arith.constant 0 : index
    %c0_7 = arith.constant 0 : index
    %8 = vector.load %arg6[%c0_6, %c0_7] : memref<32x8xf32, #tpu.memory_space<vmem>>, vector<32x8xf32>
    %cst_8 = arith.constant dense<0.000000e+00> : vector<8x8xf32>
    %9 = tpu.matmul %7, %8, %cst_8 {dimension_numbers = #tpu.dot_dimension_numbers<[1], [0], [0], [1], [0, 0, 1, 1], [], []>} : vector<8x32xf32>, vector<32x8xf32>, vector<8x8xf32> -> vector<8x8xf32>
    %c0_9 = arith.constant 0 : index
    %c0_10 = arith.constant 0 : index
    %10 = vector.load %arg7[%c0_9, %c0_10] : memref<1x8xf32, #tpu.memory_space<vmem>>, vector<1x8xf32>
    %11 = vector.broadcast %10 : vector<1x8xf32> to vector<8x8xf32>
    %12 = arith.addf %9, %11 : vector<8x8xf32>
    %cst_11 = arith.constant 0.000000e+00 : f32
    %13 = vector.broadcast %cst_11 : f32 to vector<8x8xf32>
    %14 = arith.maximumf %12, %13 : vector<8x8xf32>
    %c0_12 = arith.constant 0 : index
    %c0_13 = arith.constant 0 : index
    %c0_14 = arith.constant 0 : index
    %15 = vector.load %arg2[%c0_12, %c0_13, %c0_14] : memref<8x4x8xf32, #tpu.memory_space<vmem>>, vector<8x4x8xf32>
    %16 = vector.shape_cast %14 : vector<8x8xf32> to vector<8x1x8xf32>
    %17 = tpu.concatenate %16, %15 in 1 : vector<8x1x8xf32>, vector<8x4x8xf32> -> vector<8x5x8xf32>
    "tpu.trace_start"() <{level = 10 : i32, message = "bfd,bgd->bfg"}> : () -> ()
    %cst_15 = arith.constant dense<0.000000e+00> : vector<8x5x5xf32>
    %18 = tpu.matmul %17, %17, %cst_15 {dimension_numbers = #tpu.dot_dimension_numbers<[2], [2], [1], [1], [0, 0, 0, 1, 1, 1], [0], [0]>} : vector<8x5x8xf32>, vector<8x5x8xf32>, vector<8x5x5xf32> -> vector<8x5x5xf32>
    "tpu.trace_stop"() : () -> ()
    %19 = vector.shape_cast %18 : vector<8x5x5xf32> to vector<8x25xf32>
    %c0_16 = arith.constant 0 : index
    %c0_17 = arith.constant 0 : index
    %20 = vector.load %arg8[%c0_16, %c0_17] : memref<8x16xf32, #tpu.memory_space<vmem>>, vector<8x16xf32>
    %cst_18 = arith.constant dense<0.000000e+00> : vector<8x16xf32>
    %21 = tpu.matmul %14, %20, %cst_18 {dimension_numbers = #tpu.dot_dimension_numbers<[1], [0], [0], [1], [0, 0, 1, 1], [], []>} : vector<8x8xf32>, vector<8x16xf32>, vector<8x16xf32> -> vector<8x16xf32>
    %c0_19 = arith.constant 0 : index
    %c0_20 = arith.constant 0 : index
    %22 = vector.load %arg9[%c0_19, %c0_20] : memref<25x16xf32, #tpu.memory_space<vmem>>, vector<25x16xf32>
    %cst_21 = arith.constant dense<0.000000e+00> : vector<8x16xf32>
    %23 = tpu.matmul %19, %22, %cst_21 {dimension_numbers = #tpu.dot_dimension_numbers<[1], [0], [0], [1], [0, 0, 1, 1], [], []>} : vector<8x25xf32>, vector<25x16xf32>, vector<8x16xf32> -> vector<8x16xf32>
    %24 = arith.addf %21, %23 : vector<8x16xf32>
    %c0_22 = arith.constant 0 : index
    %c0_23 = arith.constant 0 : index
    %25 = vector.load %arg10[%c0_22, %c0_23] : memref<1x16xf32, #tpu.memory_space<vmem>>, vector<1x16xf32>
    %26 = vector.broadcast %25 : vector<1x16xf32> to vector<8x16xf32>
    %27 = arith.addf %24, %26 : vector<8x16xf32>
    %cst_24 = arith.constant 0.000000e+00 : f32
    %28 = vector.broadcast %cst_24 : f32 to vector<8x16xf32>
    %29 = arith.maximumf %27, %28 : vector<8x16xf32>
    %c0_25 = arith.constant 0 : index
    %c0_26 = arith.constant 0 : index
    %30 = vector.load %arg11[%c0_25, %c0_26] : memref<1x16xf32, #tpu.memory_space<vmem>>, vector<1x16xf32>
    %cst_27 = arith.constant dense<0.000000e+00> : vector<1x8xf32>
    %31 = tpu.matmul %30, %29, %cst_27 {dimension_numbers = #tpu.dot_dimension_numbers<[1], [1], [0], [0], [0, 0, 1, 0], [], []>} : vector<1x16xf32>, vector<8x16xf32>, vector<1x8xf32> -> vector<1x8xf32>
    %c0_28 = arith.constant 0 : index
    %c0_29 = arith.constant 0 : index
    %32 = vector.load %arg12[%c0_28, %c0_29] : memref<1x1xf32, #tpu.memory_space<vmem>>, vector<1x1xf32>
    %33 = vector.broadcast %32 : vector<1x1xf32> to vector<1x8xf32>
    %34 = arith.addf %31, %33 : vector<1x8xf32>
    %c0_30 = arith.constant 0 : index
    %c0_31 = arith.constant 0 : index
    %35 = vector.load %arg13[%c0_30, %c0_31] : memref<1x8xf32, #tpu.memory_space<vmem>>, vector<1x8xf32>
    tpu.vector_store %arg13[%c0_30, %c0_31], %34 {strides = array<i32>} : memref<1x8xf32, #tpu.memory_space<vmem>>, vector<1x8xf32>,
    %c0_32 = arith.constant 0 : index
    %c0_33 = arith.constant 0 : index
    %36 = vector.load %arg3[%c0_32, %c0_33] : memref<1x8xf32, #tpu.memory_space<vmem>>, vector<1x8xf32>
    %cst_34 = arith.constant 0.000000e+00 : f32
    %37 = vector.broadcast %cst_34 : f32 to vector<1x8xf32>
    %38 = arith.maximumf %34, %37 : vector<1x8xf32>
    %39 = arith.mulf %34, %36 : vector<1x8xf32>
    %40 = arith.subf %38, %39 : vector<1x8xf32>
    %41 = math.absf %34 : vector<1x8xf32>
    %cst_35 = arith.constant 0.000000e+00 : f32
    %42 = vector.broadcast %cst_35 : f32 to vector<1x8xf32>
    %43 = arith.subf %42, %41 : vector<1x8xf32>
    %44 = math.exp %43 : vector<1x8xf32>
    %45 = math.log1p %44 : vector<1x8xf32>
    %46 = arith.addf %40, %45 : vector<1x8xf32>
    %c0_36 = arith.constant 0 : index
    %c0_37 = arith.constant 0 : index
    %47 = vector.load %arg14[%c0_36, %c0_37] : memref<1x8xf32, #tpu.memory_space<vmem>>, vector<1x8xf32>
    tpu.vector_store %arg14[%c0_36, %c0_37], %46 {strides = array<i32>} : memref<1x8xf32, #tpu.memory_space<vmem>>, vector<1x8xf32>,
    return
  }
  func.func @transform_0(%arg0: i32) -> (i32, i32) {
    %c0_i32 = arith.constant 0 : i32
    %c0_i32_0 = arith.constant 0 : i32
    return %arg0, %c0_i32 : i32, i32
  }
  func.func @transform_1(%arg0: i32) -> (i32, i32, i32) {
    %c0_i32 = arith.constant 0 : i32
    %c0_i32_0 = arith.constant 0 : i32
    %c0_i32_1 = arith.constant 0 : i32
    return %arg0, %c0_i32, %c0_i32_0 : i32, i32, i32
  }
  func.func @transform_2(%arg0: i32) -> (i32, i32) {
    %c0_i32 = arith.constant 0 : i32
    %c0_i32_0 = arith.constant 0 : i32
    return %c0_i32, %arg0 : i32, i32
  }
  func.func @transform_3(%arg0: i32) -> (i32, i32) {
    %c0_i32 = arith.constant 0 : i32
    %c0_i32_0 = arith.constant 0 : i32
    %c0_i32_1 = arith.constant 0 : i32
    return %c0_i32, %c0_i32_0 : i32, i32
  }
  func.func @transform_4(%arg0: i32) -> (i32, i32) {
    %c0_i32 = arith.constant 0 : i32
    %c0_i32_0 = arith.constant 0 : i32
    %c0_i32_1 = arith.constant 0 : i32
    return %c0_i32, %c0_i32_0 : i32, i32
  }
  func.func @transform_5(%arg0: i32) -> (i32, i32) {
    %c0_i32 = arith.constant 0 : i32
    %c0_i32_0 = arith.constant 0 : i32
    %c0_i32_1 = arith.constant 0 : i32
    return %c0_i32, %c0_i32_0 : i32, i32
  }
  func.func @transform_6(%arg0: i32) -> (i32, i32) {
    %c0_i32 = arith.constant 0 : i32
    %c0_i32_0 = arith.constant 0 : i32
    %c0_i32_1 = arith.constant 0 : i32
    return %c0_i32, %c0_i32_0 : i32, i32
  }
  func.func @transform_7(%arg0: i32) -> (i32, i32) {
    %c0_i32 = arith.constant 0 : i32
    %c0_i32_0 = arith.constant 0 : i32
    %c0_i32_1 = arith.constant 0 : i32
    return %c0_i32, %c0_i32_0 : i32, i32
  }
  func.func @transform_8(%arg0: i32) -> (i32, i32) {
    %c0_i32 = arith.constant 0 : i32
    %c0_i32_0 = arith.constant 0 : i32
    %c0_i32_1 = arith.constant 0 : i32
    return %c0_i32, %c0_i32_0 : i32, i32
  }
  func.func @transform_9(%arg0: i32) -> (i32, i32) {
    %c0_i32 = arith.constant 0 : i32
    %c0_i32_0 = arith.constant 0 : i32
    %c0_i32_1 = arith.constant 0 : i32
    return %c0_i32, %c0_i32_0 : i32, i32
  }
  func.func @transform_10(%arg0: i32) -> (i32, i32) {
    %c0_i32 = arith.constant 0 : i32
    %c0_i32_0 = arith.constant 0 : i32
    %c0_i32_1 = arith.constant 0 : i32
    return %c0_i32, %c0_i32_0 : i32, i32
  }
  func.func @transform_11(%arg0: i32) -> (i32, i32) {
    %c0_i32 = arith.constant 0 : i32
    %c0_i32_0 = arith.constant 0 : i32
    %c0_i32_1 = arith.constant 0 : i32
    return %c0_i32, %c0_i32_0 : i32, i32
  }
  func.func @transform_12(%arg0: i32) -> (i32, i32) {
    %c0_i32 = arith.constant 0 : i32
    %c0_i32_0 = arith.constant 0 : i32
    return %c0_i32, %arg0 : i32, i32
  }
  func.func @transform_13(%arg0: i32) -> (i32, i32) {
    %c0_i32 = arith.constant 0 : i32
    %c0_i32_0 = arith.constant 0 : i32
    return %c0_i32, %arg0 : i32, i32
  }
}

</mosaic_0001>

<bundles_post_ra>
// kernel: tpu_custom_call.1
= control target key start
LH: loop header
LB: loop body
LE: loop exit
PB: predicated region body
PF: predicated region fallthrough
CT: control target
= control target key end

     0   :  { %s925_s0 = inlined_call_operand.vmem [shape: f32[8,16], index: 0, kind: input, shape index: {}]   ;;  %s926_s1 = inlined_call_operand.vmem [shape: f32[8,4,8], index: 1, kind: input, shape index: {}]   ;;  %s927_s2 = inlined_call_operand.vmem [shape: f32[1,8], index: 2, kind: input, shape index: {}]   ;;  %s928_s3 = inlined_call_operand.vmem [shape: f32[16,32], index: 3, kind: input, shape index: {}]   ;;  %s929_s4 = inlined_call_operand.vmem [shape: f32[1,32], index: 4, kind: input, shape index: {}]   ;;  %s930_s5 = inlined_call_operand.vmem [shape: f32[32,8], index: 5, kind: input, shape index: {}]   ;;  %s931_s6 = inlined_call_operand.vmem [shape: f32[1,8], index: 6, kind: input, shape index: {}]   ;;  %s932_s7 = inlined_call_operand.vmem [shape: f32[8,16], index: 7, kind: input, shape index: {}]   ;;  %s933_s8 = inlined_call_operand.vmem [shape: f32[25,16], index: 8, kind: input, shape index: {}]   ;;  %s934_s9 = inlined_call_operand.vmem [shape: f32[1,16], index: 9, kind: input, shape index: {}]   ;;  %s935_s10 = inlined_call_operand.vmem [shape: f32[1,16], index: 10, kind: input, shape index: {}]   ;;  %s936_s11 = inlined_call_operand.<no memory space> [shape: f32[1,1], index: 11, kind: input, shape index: {}]   ;;  %s937_s12 = inlined_call_operand.hbm [shape: f32[1,8], index: 12, kind: output, shape index: {0}]   ;;  %s938_s13 = inlined_call_operand.hbm [shape: f32[1,8], index: 13, kind: output, shape index: {1}]  }
   0x1   :  { %v19_v0 = vstv %s936_s11 }
   0x2   :  { %20 = vst [vmem:[#allocation2] sm:$0x1] %v19_v0 }
   0x3   :  { %21 = vsyncpa [#allocation4], 0  ;;  %v49_v1 = vld [vmem:[%s928_s3 + $0x8] sm:$0xff]  ;;  %v48_v2 = vld [vmem:[%s928_s3] sm:$0xff]  ;;  %vm54_vm0 = vcmask 130048  }
   0x4   :  { %72 = vmatpush.msra.mxu0 %v49_v1  ;;  %v47_v3 = vld [vmem:[%s925_s0] sm:$0xff]  ;;  %v82_v4 = vld [vmem:[%s930_s5 + $0x18] sm:$0xff] }
   0x5   :  { %103 = vmatpush.msra.mxu1 %v82_v4 }
   0x6   :  { %22 = vsyncpa [#allocation6], 0  ;;  %73 = vmatpush.msra.mxu0 %v48_v2  ;;  %v81_v5 = vld [vmem:[%s930_s5 + $0x10] sm:$0xff]  ;;  %v80_v6 = vld [vmem:[%s930_s5 + $0x8] sm:$0xff]  ;;  %vm87_vm1 = vcmask 261120   ;;  %vm159_vm2 = vcmask 1040384  }
   0x7   :  { %619 = vmatmul.msk.f32.vlgmr.msra.gmra.mxu0 %vm54_vm0, %v47_v3  ;;  %104 = vmatpush.msra.mxu1 %v81_v5  ;;  %v79_v7 = vld [vmem:[%s930_s5] sm:$0xff]  ;;  %v114_v17 = vld [vmem:[%s926_s1 + $0x8] sm:$0xf]  ;;  %v115_v18 = vld [vmem:[%s926_s1 + $0xc] sm:$0xf]  ;;  %vm168_vm3 = vcmask 64512  }
   0x8   :  { %v653_v8 = vld [vmem:[%s929_s4] ss:$0 sm:$0xff]  ;;  %v113_v15 = vld [vmem:[%s926_s1 + $0x4] sm:$0xf]  ;;  %v117_v19 = vld [vmem:[%s926_s1 + $0x14] sm:$0xf] }
   0x9   :  { %105 = vmatpush.msra.mxu1 %v80_v6  ;;  %v112_v12 = vld [vmem:[%s926_s1] sm:$0xf]  ;;  %v116_v21 = vld [vmem:[%s926_s1 + $0x10] sm:$0xf]  ;;  %v118_v22 = vld [vmem:[%s926_s1 + $0x18] sm:$0xf] }
   0xa   :  { %v654_v13 = vld [vmem:[%s931_s6] ss:$0 sm:$0xff]  ;;  %v143_v14 = vrot.slane %v112_v12, 7  ;;  %v119_v23 = vld [vmem:[%s926_s1 + $0x1c] sm:$0xf]  ;;  %v144_v25 = vrot.slane %v113_v15, 7 }
   0xb   :  { %106 = vmatpush.msra.mxu1 %v79_v7  ;;  %v145_v26 = vrot.slane %v114_v17, 7  ;;  %v146_v27 = vrot.slane %v115_v18, 7  ;;  %v148_v28 = vrot.slane %v117_v19, 7  ;;  %v147_v29 = vrot.slane %v116_v21, 7  ;;  %v472_v47 = vld [vmem:[%s932_s7] sm:$0xff]  ;;  %s714_s7 = smov 15  }
   0xc   :  { %v149_v30 = vrot.slane %v118_v22, 7  ;;  %v150_v31 = vrot.slane %v119_v23, 7  ;;  %v712_v50 = vmov 1983009808   ;;  %vm354_vm4 = vcmask 1047556   ;;  %s715_s0 = smov 5  }
   0xd   :  { %v359_v51 = vunpack.c.l.s4 %v712_v50  ;;  %v713_v63 = vmov 1934713408   ;;  %s716_s20 = smov 20   ;;  %s717_s21 = smov 10   ;;  %v476_v50 = vld [vmem:[%s933_s8 + $0x18] sm:$0x1] }
   0xe   :  { %v407_v0 = vunpack.c.l.s4 %v713_v63  ;;  %vm464_vm5 = vcmask 39936   ;;  %vm466_vm6 = vcmask 80896   ;;  %vm468_vm7 = vcmask 121856   ;;  %s719_s14 = smov [#allocation3]   ;;  %s605_s1 = sshll.u32 %s938_s13, 4  ;;  %s606_s1 = int_to_ptr.hbm [resolvable:$true] %s605_s1 }
   0xf   :  { %v360_v54 = vunpack.c.0.s8 %v359_v51  ;;  %v475_v51 = vld [vmem:[%s933_s8 + $0x10] sm:$0xff]  ;;  %vm470_vm8 = vcmask 162816   ;;  %vm477_vm9 = vcmask 203776   ;;  %v718_v63 = vmov 0   ;;  %s592_s15 = sshll.u32 %s719_s14, 4  ;;  %s593_s15 = int_to_ptr.vmem [resolvable:$true] %s592_s15 }
  0x10   :  { %651 = vset.pattern.permute.xlu2 %v718_v63  ;;  %652 = vset.pattern.permute.xlu0 %v718_v63  ;;  %vm566_vm10 = vcmask 57344  }
  0x84   :  { %v75_v9 = vpop.f32.mrf.mxu0 }
  0x85   :  { %v76_v10 = vadd.f32 %v653_v8, %v75_v9  ;;  %v408_v9 = vunpack.c.0.s8 %v407_v0  ;;  %v655_v0 = vld [vmem:[%s934_s9] ss:$0 sm:$0xff]  ;;  %s594_s9 = sshll.u32 %s937_s12, 4  ;;  %s720_s12 = smov [#allocation5]   ;;  %s595_s9 = int_to_ptr.hbm [resolvable:$true] %s594_s9 }
  0x86   :  { %s603_s11 = sshll.u32 %s720_s12, 4  ;;  %s604_s11 = int_to_ptr.vmem [resolvable:$true] %s603_s11 }
  0x87   :  { %v78_v11 = vmax.f32 %v76_v10, 0.0 }
  0x89   :  { %620 = vmatmul.msk.f32.vlgmr.msra.gmra.mxu1 %vm87_vm1, %v78_v11 }
 0x106   :  { %v108_v16 = vpop.f32.mrf.mxu1 }
 0x107   :  { %v109_v20 = vadd.f32 %v654_v13, %v108_v16 }
 0x109   :  { %v111_v24 = vmax.f32 %v109_v20, 0.0 }
 0x10b   :  { %v160_v32 = vsel %vm159_vm2, %v111_v24, %v143_v14  ;;  %v121_v33 = vrot.slane %v111_v24, 1  ;;  %v122_v34 = vrot.slane %v111_v24, 2  ;;  %v123_v35 = vrot.slane %v111_v24, 3 }
 0x10c   :  { %621 = vmatpush.xpose.msk.msra.mxu2 %vm168_vm3, %v160_v32  ;;  %v125_v36 = vrot.slane %v111_v24, 5  ;;  %v124_v37 = vrot.slane %v111_v24, 4  ;;  %v126_v38 = vrot.slane %v111_v24, 6  ;;  %v127_v39 = vrot.slane %v111_v24, 7 }
 0x10d   :  { %v161_v40 = vsel %vm159_vm2, %v121_v33, %v144_v25  ;;  %v162_v41 = vsel %vm159_vm2, %v122_v34, %v145_v26  ;;  %v163_v42 = vsel %vm159_vm2, %v123_v35, %v146_v27 }
 0x10e   :  { %623 = vmatpush.xpose.msk.msra.mxu3 %vm168_vm3, %v161_v40  ;;  %625 = vmatpush.xpose.msk.msrb.mxu0 %vm168_vm3, %v162_v41  ;;  %v165_v43 = vsel %vm159_vm2, %v125_v36, %v148_v28  ;;  %v164_v44 = vsel %vm159_vm2, %v124_v37, %v147_v29  ;;  %v166_v45 = vsel %vm159_vm2, %v126_v38, %v149_v30 }
 0x10f   :  { %631 = vmatpush.xpose.msk.msrb.mxu1 %vm168_vm3, %v165_v43  ;;  %622 = vmatmul.msk.f32.vlgmr.msra.gmra.mxu2 %vm168_vm3, %v160_v32  ;;  %v167_v46 = vsel %vm159_vm2, %v127_v39, %v150_v31 }
 0x110   :  { %627 = vmatpush.xpose.msk.msrb.mxu2 %vm168_vm3, %v163_v42 }
 0x111   :  { %624 = vmatmul.msk.f32.vlgmr.msra.gmra.mxu3 %vm168_vm3, %v161_v40  ;;  %626 = vmatmul.msk.f32.vlgmr.msrb.gmra.mxu0 %vm168_vm3, %v162_v41 }
 0x112   :  { %629 = vmatpush.xpose.msk.msrb.mxu3 %vm168_vm3, %v164_v44  ;;  %633 = vmatpush.xpose.msk.msra.mxu0 %vm168_vm3, %v166_v45 }
 0x113   :  { %632 = vmatmul.msk.f32.vlgmr.msrb.gmra.mxu1 %vm168_vm3, %v165_v43 }
 0x114   :  { %635 = vmatpush.xpose.msk.msra.mxu2 %vm168_vm3, %v167_v46  ;;  %521 = vmatpush.msra.mxu1 %v472_v47 }
 0x116   :  { %637 = vmatpush.msk.msra.mxu3 %vm159_vm2, %v476_v50 }
 0x117   :  { %628 = vmatmul.msk.f32.vlgmr.msrb.gmra.mxu2 %vm168_vm3, %v163_v42 }
 0x118   :  { %497 = vmatpush.msra.mxu3 %v475_v51 }
 0x119   :  { %630 = vmatmul.msk.f32.vlgmr.msrb.gmra.mxu3 %vm168_vm3, %v164_v44  ;;  %634 = vmatmul.msk.f32.vlgmr.msra.gmra.mxu0 %vm168_vm3, %v166_v45 }
 0x11b   :  { %639 = vmatmul.msk.f32.vlgmr.msra.gmra.mxu1 %vm168_vm3, %v111_v24 }
 0x11f   :  { %636 = vmatmul.msk.f32.vlgmr.msra.gmra.mxu2 %vm168_vm3, %v167_v46 }
 0x18e   :  { %v235_v48 = vpop.f32.mrf.mxu0 }
 0x18f   :  { %v353_v53 = vrot.slane %v235_v48, 4 }
 0x190   :  { %v304_v1 = vpop.f32.mrf.mxu1 }
 0x191   :  { %v392_v8 = vrot.slane %v304_v1, 4 }
 0x192   :  { %v189_v49 = vpop.f32.mrf.mxu2 }
 0x193   :  { %v355_v55 = vsel %vm354_vm4, %v353_v53, %v189_v49  ;;  %v356_v19 = vrot.slane %v189_v49, 4  ;;  %v473_v53 = vld [vmem:[%s933_s8] sm:$0xff] }
 0x194   :  { %v212_v52 = vpop.f32.mrf.mxu3  ;;  %v361_v59 = vperm.slane %v355_v55, %v360_v54 }
 0x195   :  { %v368_v6 = vrot.slane %v212_v52, 4  ;;  %v357_v31 = vsel %vm354_vm4, %v235_v48, %v356_v19 }
 0x196   :  { %v327_v56 = vpop.f32.mrf.mxu0  ;;  %v404_v5 = vrot.slane %v361_v59, 4  ;;  %v365_v40 = vperm.slane %v357_v31, %v360_v54 }
 0x197   :  { %v378_v61 = vrot.slane %v327_v56, 4 }
 0x19a   :  { %v258_v57 = vpop.f32.mrf.mxu2 }
 0x19b   :  { %v366_v58 = vrot.slane %v258_v57, 4  ;;  %v369_v10 = vsel %vm354_vm4, %v258_v57, %v368_v6  ;;  %v532_v6 = vld [vmem:[%s935_s10] sm:$0x1] }
 0x19c   :  { %v281_v60 = vpop.f32.mrf.mxu3  ;;  %v377_v20 = vperm.slane %v369_v10, %v360_v54 }
 0x19d   :  { %v367_v62 = vsel %vm354_vm4, %v366_v58, %v212_v52  ;;  %v379_v3 = vsel %vm354_vm4, %v378_v61, %v281_v60  ;;  %v380_v4 = vrot.slane %v281_v60, 4  ;;  %v474_v52 = vld [vmem:[%s933_s8 + $0x8] sm:$0xff] }
 0x19e   :  { %v373_v2 = vperm.slane %v367_v62, %v360_v54  ;;  %v385_v11 = vperm.slane %v379_v3, %v360_v54  ;;  %v414_v34 = vrot.slane %v377_v20, 4  ;;  %498 = vmatpush.msra.mxu3 %v474_v52  ;;  %v533_v62 = vld [vmem:[#allocation2] sm:$0x1] }
 0x19f   :  { %v381_v14 = vsel %vm354_vm4, %v327_v56, %v380_v4  ;;  %536 = vperm.xlu2 %651, %v533_v62  }
 0x1a0   :  { %v402_v7 = vrot.slane %v373_v2, 4  ;;  %v405_v13 = vsel %vm354_vm4, %v373_v2, %v404_v5  ;;  %v389_v23 = vperm.slane %v381_v14, %v360_v54  ;;  %v422_v24 = vrot.slane %v385_v11, 4  ;;  %499 = vmatpush.msra.mxu3 %v473_v53 }
 0x1a1   :  { %v413_v22 = vperm.slane %v405_v13, %v408_v9  ;;  %v415_v43 = vsel %vm354_vm4, %v414_v34, %v365_v40 }
 0x1a2   :  { %v350_v12 = vpop.f32.mrf.mxu2  ;;  %v403_v18 = vsel %vm354_vm4, %v402_v7, %v361_v59  ;;  %v419_v46 = vperm.slane %v415_v43, %v408_v9 }
 0x1a3   :  { %v390_v15 = vrot.slane %v350_v12, 4  ;;  %v393_v16 = vsel %vm354_vm4, %v350_v12, %v392_v8  ;;  %v409_v27 = vperm.slane %v403_v18, %v408_v9  ;;  %v444_v33 = vrot.slane %v413_v22, 4 }
 0x1a4   :  { %v401_v17 = vperm.slane %v393_v16, %v360_v54 }
 0x1a5   :  { %v391_v21 = vsel %vm354_vm4, %v390_v15, %v304_v1  ;;  %v440_v38 = vrot.slane %v409_v27, 4  ;;  %v523_v1 = vpop.f32.mrf.mxu1 }
 0x1a6   :  { %v397_v25 = vperm.slane %v391_v21, %v360_v54  ;;  %v432_v26 = vrot.slane %v401_v17, 4  ;;  %v568_v17 = vld [vmem:[%s927_s2] sm:$0x1] }
 0x1a8   :  { %v420_v28 = vrot.slane %v397_v25, 4  ;;  %v423_v29 = vsel %vm354_vm4, %v397_v25, %v422_v24  ;;  %v433_v30 = vsel %vm354_vm4, %v432_v26, %v389_v23 }
 0x1a9   :  { %v431_v32 = vperm.slane %v423_v29, %v408_v9  ;;  %v437_v39 = vperm.slane %v433_v30, %v408_v9 }
 0x1aa   :  { %v421_v35 = vsel %vm354_vm4, %v420_v28, %v385_v11 }
 0x1ab   :  { %v445_v36 = vsel %vm354_vm4, %v431_v32, %v444_v33  ;;  %v427_v37 = vperm.slane %v421_v35, %v408_v9  ;;  %v446_v44 = vrot.slane %v437_v39, 4  ;;  %v442_v47 = vrot.slane %v431_v32, 4 }
 0x1ac   :  { %457 = vrot.lane.b32.xlu1 %v445_v36, %s714_s7 }
 0x1ad   :  { %v441_v41 = vsel %vm354_vm4, %v427_v37, %v440_v38  ;;  %v438_v42 = vrot.slane %v427_v37, 4  ;;  %v447_v48 = vsel %vm354_vm4, %v446_v44, %v419_v46  ;;  %v443_v49 = vsel %vm354_vm4, %v442_v47, %v413_v22 }
 0x1ae   :  { %449 = vrot.lane.b32.xlu0 %v441_v41, %s715_s0 }
 0x1af   :  { %v439_v45 = vsel %vm354_vm4, %v438_v42, %v409_v27 }
 0x1b4   :  { %461 = vrot.lane.b32.xlu1 %v447_v48, %s716_s20 }
 0x1b6   :  { %453 = vrot.lane.b32.xlu0 %v443_v49, %s717_s21 }
 0x1f9   :  { %v537_v7 = vpop.permute.xlu2 %536 }
 0x1fa   :  { %v539_v8 = vperm.slane %v537_v7, 0 }
 0x21e   :  { %v458_v54 = vpop.permute.xlu1 %457 }
 0x220   :  { %v450_v55 = vpop.permute.xlu0 %449 }
 0x221   :  { %v465_v56 = vsel %vm464_vm5, %v439_v45, %v450_v55 }
 0x226   :  { %v462_v59 = vpop.permute.xlu1 %461 }
 0x228   :  { %v454_v57 = vpop.permute.xlu0 %453 }
 0x229   :  { %v467_v58 = vsel %vm466_vm6, %v465_v56, %v454_v57 }
 0x22a   :  { %v469_v60 = vsel %vm468_vm7, %v467_v58, %v458_v54 }
 0x22b   :  { %v471_v61 = vsel %vm470_vm8, %v469_v60, %v462_v59 }
 0x22c   :  { %638 = vmatmul.msk.f32.vlgmr.msra.gmra.mxu3 %vm477_vm9, %v471_v61 }
 0x2af   :  { %v501_v2 = vpop.f32.mrf.mxu3 }
 0x2b0   :  { %v524_v3 = vadd.f32 %v523_v1, %v501_v2 }
 0x2b2   :  { %v530_v4 = vadd.f32 %v655_v0, %v524_v3 }
 0x2b4   :  { %v531_v5 = vmax.f32 %v530_v4, 0.0 }
 0x2b6   :  { %640 = vmatpush.xpose.msk.msrb.mxu0 %vm54_vm0, %v531_v5 }
 0x2b9   :  { %641 = vmatmul.msk.f32.vlgmr.msrb.gmra.mxu0 %vm54_vm0, %v532_v6 }
 0x336   :  { %v563_v9 = vpop.f32.mrf.mxu0 }
 0x337   :  { %v564_v10 = vadd.f32 %v563_v9, %v539_v8 }
 0x339   :  { %v572_v11 = vand.u32 2147483647, %v564_v10  ;;  %567 = vst.msk [vmem:[#allocation3] sm:$0x1] %vm566_vm10, %v564_v10  ;;  %v569_v19 = vmax.f32 %v564_v10, 0.0  ;;  %v570_v20 = vmul.f32 %v568_v17, %v564_v10 }
 0x33a   :  { %597 = dma.vmem_to_hbm [thread:$0]  %s593_s15, 16, %s595_s9, [#allocation4]  }
 0x33b   :  { %v573_v12 = vsub.f32 0.0, %v572_v11  ;;  %v571_v25 = vsub.f32 %v569_v19, %v570_v20 }
 0x33d   :  { %v574_v13 = vmul.f32 1.442695, %v573_v12 }
 0x33f   :  { %656 = vpow2.f32 %v574_v13 }
 0x345   :  { %v657_v14 = vpop.eup %656 }
 0x346   :  { %v576_v15 = vadd.f32 1.0, %v657_v14  ;;  %v579_v16 = vmul.f32 -0.5, %v657_v14  ;;  %v582_v21 = vand.u32 2147483647, %v657_v14 }
 0x348   :  { %658 = vlog2.f32 %v576_v15  ;;  %v580_v18 = vadd.f32 1.0, %v579_v16  ;;  %vm583_vm11 = vcmp.lt.f32.partialorder %v582_v21, 0.0004427343 }
 0x34a   :  { %v581_v24 = vmul.f32 %v657_v14, %v580_v18 }
 0x34e   :  { %v659_v22 = vpop.eup %658 }
 0x34f   :  { %v578_v23 = vmul.f32 0.6931472, %v659_v22 }
 0x351   :  { %v584_v26 = vsel %vm583_vm11, %v581_v24, %v578_v23 }
 0x352   :  { %v585_v27 = vadd.f32 %v584_v26, %v571_v25 }
 0x354   :  { %586 = vst.msk [vmem:[#allocation5] sm:$0x1] %vm566_vm10, %v585_v27 }
 0x355   :  { %608 = dma.vmem_to_hbm [thread:$0]  %s604_s11, 16, %s606_s1, [#allocation6]  }
 0x356   :  { %708 = dma.done.wait [#allocation4], 16  }
 0x357   :  { %709 = vsyncadd [#allocation4], 4294967280 }
 0x358   :  { %710 = dma.done.wait [#allocation6], 16  }
 0x359   :  { %711 = vsyncadd [#allocation6], 4294967280 }
 0x35a   :  { %617 = vsyncpa [#allocation4], 1 }
 0x35b   :  { %618 = vsyncpa [#allocation6], 1 }

</bundles_post_ra>
